<compile_context>
chip_gen: v7x
topology: tpu7x:2x2x1
jax: 0.10.0
libtpu: 0.0.40
codegen_flags: <defaults>
</compile_context>

<pallas_src>
import functools

import jax
import jax.numpy as jnp
from jax.experimental import pallas as pl
from jax.experimental.pallas import tpu as pltpu


# ----------------------------------------------------------------------------
# Kernel 1: per-voxel channel MLP (the three 1x1x1 conv stages, BN folded)
# ----------------------------------------------------------------------------
def _pointwise_conv_kernel(x_ref, p0_ref, p1_ref, p2_ref, o_ref, *, g):
    x = x_ref[0]                                               # (G, TN)
    p0 = p0_ref[...]                                           # (16, G+1) = [w0 | b0]
    h = jnp.dot(p0[:, :g], x, preferred_element_type=jnp.float32) + p0[:, g:g + 1]
    h = jnp.maximum(h, 0.0)                                    # (16, TN)
    p1 = p1_ref[...]                                           # (8, 17) = [w1 | b1]
    h = jnp.dot(p1[:, :16], h, preferred_element_type=jnp.float32) + p1[:, 16:17]
    h = jnp.maximum(h, 0.0)                                    # (8, TN)
    p2 = p2_ref[...]                                           # (1, 9) = [w2 | b2]
    o_ref[0] = jnp.dot(p2[:, :8], h, preferred_element_type=jnp.float32) + p2[:, 8:9]


# ----------------------------------------------------------------------------
# Kernel 2: grid_sample (bilinear, border, align_corners=False) + adaptive
#           spatial aggregation (weighted sum over neighbors)
# Grid: (B, pixel-tiles, neighbors); neighbor axis accumulates into o_ref.
# ----------------------------------------------------------------------------
def _aggregate_kernel(ssel_ref, score_ref, coords_ref, w_ref, o_ref, *,
                      depth, height, width):
    n = pl.program_id(2)

    s2 = score_ref[0]                       # (D*H, W), resident per batch
    c = coords_ref[0]                       # (2, TP) : rows = (gx, gy)
    gx = c[0:1, :]
    gy = c[1:2, :]
    tp = gx.shape[-1]

    # un-normalize (align_corners=False) and clamp (padding_mode='border')
    ix = (gx + 1.0) * (0.5 * width) - 0.5
    iy = (gy + 1.0) * (0.5 * height) - 0.5
    ix = jnp.clip(ix, 0.0, width - 1.0)
    iy = jnp.clip(iy, 0.0, height - 1.0)
    x0 = jnp.floor(ix)
    y0 = jnp.floor(iy)
    wx1 = ix - x0
    wy1 = iy - y0
    x1 = jnp.minimum(x0 + 1.0, width - 1.0)
    y1 = jnp.minimum(y0 + 1.0, height - 1.0)

    # factorized bilinear interpolation: two-hot x matrix (W, TP) and y matrix
    # (H, TP); columns sum to 1 (degenerate border taps collapse correctly).
    xs = jax.lax.broadcasted_iota(jnp.int32, (width, tp), 0).astype(jnp.float32)
    ax = jnp.where(xs == x0, 1.0 - wx1, 0.0) + jnp.where(xs == x1, wx1, 0.0)
    ys = jax.lax.broadcasted_iota(jnp.int32, (height, tp), 0).astype(jnp.float32)
    ay = jnp.where(ys == y0, 1.0 - wy1, 0.0) + jnp.where(ys == y1, wy1, 0.0)

    # x gather + interp on the MXU: (D*H, W) @ (W, TP) -> (D*H, TP)
    t = jnp.dot(s2, ax, preferred_element_type=jnp.float32)
    # y taps on the VPU, then per-depth row-sum via a static 0/1 selection
    # matmul (D, D*H) @ (D*H, TP) -> (D, TP)
    ayt = jnp.concatenate([ay] * depth, axis=0)                # (D*H, TP)
    sampled = jnp.dot(ssel_ref[...], t * ayt,
                      preferred_element_type=jnp.float32)

    contrib = sampled * w_ref[0]                               # (D, TP)

    @pl.when(n == 0)
    def _():
        o_ref[0] = contrib

    @pl.when(n > 0)
    def _():
        o_ref[0] += contrib


def _pick_lane_tile(n, max_tile):
    """Largest multiple-of-128 divisor of n (n itself a multiple of 128)."""
    best = 128
    t = 128
    limit = min(n, max_tile)
    while t <= limit:
        if n % t == 0:
            best = t
        t += 128
    return best


# ----------------------------------------------------------------------------
# BN folding helper (inference-mode running stats)
# ----------------------------------------------------------------------------
def _fold_bn(w, gamma, beta, mean, var, eps=1e-5):
    scale = gamma / jnp.sqrt(var + eps)
    w_eff = (w * scale[:, None]).astype(jnp.float32)
    b_eff = (beta - scale * mean).reshape(-1, 1).astype(jnp.float32)
    return w_eff, b_eff


# ----------------------------------------------------------------------------
# Module-equivalent wrapper
# ----------------------------------------------------------------------------
class SimilarityNet:
    """JAX/Pallas port of patchmatchnet SimilarityNet (eval mode)."""

    def __init__(self, G: int, neighbors: int = 9, *, key) -> None:
        self.G = G
        self.neighbors = neighbors
        ks = jax.random.split(key, 12)

        def bn_params(k0, k1, k2, k3, c):
            gamma = jax.random.uniform(k0, (c,), jnp.float32, 0.5, 1.5)
            beta = 0.1 * jax.random.normal(k1, (c,), jnp.float32)
            mean = 0.1 * jax.random.normal(k2, (c,), jnp.float32)
            var = jax.random.uniform(k3, (c,), jnp.float32, 0.5, 1.5)
            return gamma, beta, mean, var

        w0 = jax.random.normal(ks[0], (16, G), jnp.float32) / jnp.sqrt(float(G))
        g0, be0, m0, v0 = bn_params(ks[1], ks[2], ks[3], ks[4], 16)
        w1 = 0.25 * jax.random.normal(ks[5], (8, 16), jnp.float32)
        g1, be1, m1, v1 = bn_params(ks[6], ks[7], ks[8], ks[9], 8)
        w2 = 0.35 * jax.random.normal(ks[10], (1, 8), jnp.float32)
        b2 = 0.1 * jax.random.normal(ks[11], (1,), jnp.float32)

        self.raw_params = dict(w0=w0, g0=g0, be0=be0, m0=m0, v0=v0,
                               w1=w1, g1=g1, be1=be1, m1=m1, v1=v1,
                               w2=w2, b2=b2)

        # fold BatchNorm (running stats) into effective affine conv weights,
        # then pack each stage's (weight | bias) into a single VMEM block.
        w0f, b0f = _fold_bn(w0, g0, be0, m0, v0)
        w1f, b1f = _fold_bn(w1, g1, be1, m1, v1)
        w2f = w2.astype(jnp.float32)
        b2f = b2.reshape(1, 1).astype(jnp.float32)
        self.p0 = jnp.concatenate([w0f, b0f], axis=1)    # (16, G+1)
        self.p1 = jnp.concatenate([w1f, b1f], axis=1)    # (8, 17)
        self.p2 = jnp.concatenate([w2f, b2f], axis=1)    # (1, 9)

    def __call__(self, x1, grid, weight):
        """x1: (B, G, D, H, W); grid: (B, neighbors*H, W, 2);
        weight: (B, D, neighbors, H, W)  ->  (B, D, H, W)."""
        x1 = x1.astype(jnp.float32)
        grid = grid.astype(jnp.float32)
        weight = weight.astype(jnp.float32)

        B, G, D, H, W = x1.shape
        nbr = self.neighbors
        HW = H * W
        N = D * HW
        vmem_params = dict(vmem_limit_bytes=64 * 1024 * 1024)

        # ---------------- kernel 1: channel MLP over fused D*H*W axis --------
        x_flat = x1.reshape(B, G, N)                         # pure reshape
        TN = N if N <= 16384 else 16384
        grid_n = pl.cdiv(N, TN)
        k1 = functools.partial(_pointwise_conv_kernel, g=G)
        score_flat = pl.pallas_call(
            k1,
            out_shape=jax.ShapeDtypeStruct((B, 1, N), jnp.float32),
            grid=(B, grid_n),
            in_specs=[
                pl.BlockSpec((1, G, TN), lambda b, j: (b, 0, j)),
                pl.BlockSpec((16, G + 1), lambda b, j: (0, 0)),
                pl.BlockSpec((8, 17), lambda b, j: (0, 0)),
                pl.BlockSpec((1, 9), lambda b, j: (0, 0)),
            ],
            out_specs=pl.BlockSpec((1, 1, TN), lambda b, j: (b, 0, j)),
            compiler_params=pltpu.CompilerParams(
                dimension_semantics=("parallel", "parallel"), **vmem_params),
        )(x_flat, self.p0, self.p1, self.p2)

        score2 = score_flat.reshape(B, D * H, W)            # pure reshape

        # ---------------- kernel 2: grid_sample + neighbor aggregation -------
        # layout plumbing only: pure reshapes for `weight`, tiny copies for
        # gx/gy; pixel axis padded to a multiple of 128 only when needed.
        HWp = ((HW + 127) // 128) * 128
        pad = HWp - HW
        g5 = grid.reshape(B, nbr, H, W, 2)
        gx = g5[..., 0].reshape(B, nbr, HW)
        gy = g5[..., 1].reshape(B, nbr, HW)
        w_flat = weight.reshape(B, D, nbr, HW)               # pure reshape
        if pad:
            gx = jnp.pad(gx, ((0, 0), (0, 0), (0, pad)))
            gy = jnp.pad(gy, ((0, 0), (0, 0), (0, pad)))
            w_flat = jnp.pad(w_flat, ((0, 0), (0, 0), (0, 0), (0, pad)))
        coords = jnp.stack([gx.reshape(B, nbr * HWp),
                            gy.reshape(B, nbr * HWp)], axis=1)   # (B, 2, nbr*HWp)
        w_flat = w_flat.reshape(B, D, nbr * HWp)              # pure reshape

        # static 0/1 selection matrix for the per-depth y-reduction
        ssel = (jnp.arange(D)[:, None] ==
                (jnp.arange(D * H) // H)[None, :]).astype(jnp.float32)  # (D, D*H)

        TP = _pick_lane_tile(HWp, 512)   # bounds the (D*H, TP) temporaries
        num_p = HWp // TP
        k2 = functools.partial(_aggregate_kernel, depth=D, height=H, width=W)
        out = pl.pallas_call(
            k2,
            out_shape=jax.ShapeDtypeStruct((B, D, HWp), jnp.float32),
            grid=(B, num_p, nbr),
            in_specs=[
                pl.BlockSpec((D, D * H), lambda b, p, n: (0, 0)),
                pl.BlockSpec((1, D * H, W), lambda b, p, n: (b, 0, 0)),
                pl.BlockSpec((1, 2, TP),
                             lambda b, p, n: (b, 0, n * num_p + p)),
                pl.BlockSpec((1, D, TP),
                             lambda b, p, n: (b, 0, n * num_p + p)),
            ],
            out_specs=pl.BlockSpec((1, D, TP), lambda b, p, n: (b, 0, p)),
            compiler_params=pltpu.CompilerParams(
                dimension_semantics=("parallel", "parallel", "arbitrary"),
                **vmem_params),
        )(ssel, score2, coords, w_flat)

        return out[:, :, :HW].reshape(B, D, H, W)


# ----------------------------------------------------------------------------
# Pure-JAX reference (uses the raw conv/BN parameters, explicit grid_sample)
# ----------------------------------------------------------------------------
def _ref_grid_sample_border(img, grid):
    """img: (B, C, H, W); grid: (B, Hg, Wg, 2) normalized coords.
    mode=bilinear, padding_mode=border, align_corners=False."""
    B, C, H, W = img.shape
    gx = grid[..., 0]
    gy = grid[..., 1]
    ix = (gx + 1.0) * (W * 0.5) - 0.5
    iy = (gy + 1.0) * (H * 0.5) - 0.5
    ix = jnp.clip(ix, 0.0, W - 1.0)
    iy = jnp.clip(iy, 0.0, H - 1.0)
    x0 = jnp.floor(ix)
    y0 = jnp.floor(iy)
    wx1 = ix - x0
    wy1 = iy - y0
    x0i = x0.astype(jnp.int32)
    y0i = y0.astype(jnp.int32)
    x1i = jnp.minimum(x0i + 1, W - 1)
    y1i = jnp.minimum(y0i + 1, H - 1)

    def gather(yy, xx):
        return jax.vmap(lambda im, y, x: im[:, y, x])(img, yy, xx)  # (B,C,Hg,Wg)

    v00 = gather(y0i, x0i)
    v01 = gather(y0i, x1i)
    v10 = gather(y1i, x0i)
    v11 = gather(y1i, x1i)
    wx1e = wx1[:, None]
    wy1e = wy1[:, None]
    wx0e = 1.0 - wx1e
    wy0e = 1.0 - wy1e
    return v00 * wy0e * wx0e + v01 * wy0e * wx1e + v10 * wy1e * wx0e + v11 * wy1e * wx1e


def _ref_forward(raw, x1, grid, weight, neighbors):
    eps = 1e-5

    def conv_bn_relu(x, w, gamma, beta, mean, var):
        y = jnp.einsum("oc,bcdhw->bodhw", w, x, precision="highest")
        scale = (gamma / jnp.sqrt(var + eps))[None, :, None, None, None]
        shift = (beta - gamma * mean / jnp.sqrt(var + eps))[None, :, None, None, None]
        return jnp.maximum(y * scale + shift, 0.0)

    h = conv_bn_relu(x1, raw["w0"], raw["g0"], raw["be0"], raw["m0"], raw["v0"])
    h = conv_bn_relu(h, raw["w1"], raw["g1"], raw["be1"], raw["m1"], raw["v1"])
    s = jnp.einsum("oc,bcdhw->bodhw", raw["w2"], h, precision="highest")
    s = s + raw["b2"][None, :, None, None, None]
    s = s[:, 0]                                        # (B, D, H, W)
    B, D, H, W = s.shape
    samp = _ref_grid_sample_border(s, grid)            # (B, D, nbr*H, W)
    samp = samp.reshape(B, D, neighbors, H, W)
    return jnp.sum(samp * weight, axis=2)


if __name__ == "__main__":
    key = jax.random.PRNGKey(0)
    kparam, kx, kg, kw = jax.random.split(key, 4)

    B, G, D, H, W, nbr = 2, 4, 8, 16, 16, 9
    net = SimilarityNet(G=G, neighbors=nbr, key=kparam)

    x1 = jax.random.normal(kx, (B, G, D, H, W), jnp.float32)
    grid = jax.random.uniform(kg, (B, nbr * H, W, 2), jnp.float32,
                              minval=-1.0, maxval=1.0)
    weight = jax.nn.softmax(
        jax.random.normal(kw, (B, D, nbr, H, W), jnp.float32), axis=2)

    out = jax.block_until_ready(net(x1, grid, weight))
    assert out.shape == (B, D, H, W)
    assert bool(jnp.all(jnp.isfinite(out)))

    ref = _ref_forward(net.raw_params, x1, grid, weight, nbr)
    assert bool(jnp.allclose(out, ref, rtol=2e-3, atol=2e-3)), (
        float(jnp.max(jnp.abs(out - ref))))

    print("KERNEL_OK")
</pallas_src>

<mosaic_0001>
module attributes {stable_mosaic.version = 11 : i64} {
  func.func @_pointwise_conv_kernel(%arg0: i32, %arg1: i32, %arg2: memref<1x4x2048xf32, #tpu.memory_space<vmem>>, %arg3: memref<16x5xf32, #tpu.memory_space<vmem>>, %arg4: memref<8x17xf32, #tpu.memory_space<vmem>>, %arg5: memref<1x9xf32, #tpu.memory_space<vmem>>, %arg6: memref<1x1x2048xf32, #tpu.memory_space<vmem>>) attributes {dimension_semantics = [#tpu.dimension_semantics<parallel>, #tpu.dimension_semantics<parallel>], iteration_bounds = array<i64: 2, 1>, scalar_prefetch = 0 : i64, scratch_operands = 0 : i64, tpu.core_type = #tpu.core_type<tc>, window_params = [{transform_indices = @transform_0, window_bounds = array<i64: 1, 4, 2048>}, {pipeline_mode = #tpu.pipeline_mode<synchronous>, transform_indices = @transform_1, window_bounds = array<i64: 16, 5>}, {pipeline_mode = #tpu.pipeline_mode<synchronous>, transform_indices = @transform_2, window_bounds = array<i64: 8, 17>}, {pipeline_mode = #tpu.pipeline_mode<synchronous>, transform_indices = @transform_3, window_bounds = array<i64: 1, 9>}, {transform_indices = @transform_4, window_bounds = array<i64: 1, 1, 2048>}]} {
    %c0 = arith.constant 0 : index
    %c0_0 = arith.constant 0 : index
    %c0_1 = arith.constant 0 : index
    %0 = vector.load %arg2[%c0, %c0_0, %c0_1] : memref<1x4x2048xf32, #tpu.memory_space<vmem>>, vector<1x4x2048xf32>
    %1 = vector.shape_cast %0 : vector<1x4x2048xf32> to vector<4x2048xf32>
    %c0_2 = arith.constant 0 : index
    %c0_3 = arith.constant 0 : index
    %2 = vector.load %arg3[%c0_2, %c0_3] : memref<16x5xf32, #tpu.memory_space<vmem>>, vector<16x5xf32>
    %3 = vector.extract_strided_slice %2 {offsets = [0, 0], sizes = [16, 4], strides = [1, 1]} : vector<16x5xf32> to vector<16x4xf32>
    %cst = arith.constant dense<0.000000e+00> : vector<16x2048xf32>
    %4 = tpu.matmul %3, %1, %cst {dimension_numbers = #tpu.dot_dimension_numbers<[1], [0], [0], [1], [0, 0, 1, 1], [], []>} : vector<16x4xf32>, vector<4x2048xf32>, vector<16x2048xf32> -> vector<16x2048xf32>
    %5 = vector.extract_strided_slice %2 {offsets = [0, 4], sizes = [16, 1], strides = [1, 1]} : vector<16x5xf32> to vector<16x1xf32>
    %6 = vector.broadcast %5 : vector<16x1xf32> to vector<16x2048xf32>
    %7 = arith.addf %4, %6 : vector<16x2048xf32>
    %cst_4 = arith.constant 0.000000e+00 : f32
    %8 = vector.broadcast %cst_4 : f32 to vector<16x2048xf32>
    %9 = arith.maximumf %7, %8 : vector<16x2048xf32>
    %c0_5 = arith.constant 0 : index
    %c0_6 = arith.constant 0 : index
    %10 = vector.load %arg4[%c0_5, %c0_6] : memref<8x17xf32, #tpu.memory_space<vmem>>, vector<8x17xf32>
    %11 = vector.extract_strided_slice %10 {offsets = [0, 0], sizes = [8, 16], strides = [1, 1]} : vector<8x17xf32> to vector<8x16xf32>
    %cst_7 = arith.constant dense<0.000000e+00> : vector<8x2048xf32>
    %12 = tpu.matmul %11, %9, %cst_7 {dimension_numbers = #tpu.dot_dimension_numbers<[1], [0], [0], [1], [0, 0, 1, 1], [], []>} : vector<8x16xf32>, vector<16x2048xf32>, vector<8x2048xf32> -> vector<8x2048xf32>
    %13 = vector.extract_strided_slice %10 {offsets = [0, 16], sizes = [8, 1], strides = [1, 1]} : vector<8x17xf32> to vector<8x1xf32>
    %14 = vector.broadcast %13 : vector<8x1xf32> to vector<8x2048xf32>
    %15 = arith.addf %12, %14 : vector<8x2048xf32>
    %cst_8 = arith.constant 0.000000e+00 : f32
    %16 = vector.broadcast %cst_8 : f32 to vector<8x2048xf32>
    %17 = arith.maximumf %15, %16 : vector<8x2048xf32>
    %c0_9 = arith.constant 0 : index
    %c0_10 = arith.constant 0 : index
    %18 = vector.load %arg5[%c0_9, %c0_10] : memref<1x9xf32, #tpu.memory_space<vmem>>, vector<1x9xf32>
    %19 = vector.extract_strided_slice %18 {offsets = [0, 0], sizes = [1, 8], strides = [1, 1]} : vector<1x9xf32> to vector<1x8xf32>
    %cst_11 = arith.constant dense<0.000000e+00> : vector<1x2048xf32>
    %20 = tpu.matmul %19, %17, %cst_11 {dimension_numbers = #tpu.dot_dimension_numbers<[1], [0], [0], [1], [0, 0, 1, 1], [], []>} : vector<1x8xf32>, vector<8x2048xf32>, vector<1x2048xf32> -> vector<1x2048xf32>
    %21 = vector.extract_strided_slice %18 {offsets = [0, 8], sizes = [1, 1], strides = [1, 1]} : vector<1x9xf32> to vector<1x1xf32>
    %22 = vector.broadcast %21 : vector<1x1xf32> to vector<1x2048xf32>
    %23 = arith.addf %20, %22 : vector<1x2048xf32>
    %c0_12 = arith.constant 0 : index
    %c0_13 = arith.constant 0 : index
    %c0_14 = arith.constant 0 : index
    %24 = vector.load %arg6[%c0_12, %c0_13, %c0_14] : memref<1x1x2048xf32, #tpu.memory_space<vmem>>, vector<1x1x2048xf32>
    %25 = vector.shape_cast %24 : vector<1x1x2048xf32> to vector<1x2048xf32>
    %26 = vector.shape_cast %23 : vector<1x2048xf32> to vector<1x1x2048xf32>
    tpu.vector_store %arg6[%c0_12, %c0_13, %c0_14], %26 {strides = array<i32>} : memref<1x1x2048xf32, #tpu.memory_space<vmem>>, vector<1x1x2048xf32>,
    return
  }
  func.func @transform_0(%arg0: i32, %arg1: i32) -> (i32, i32, i32) {
    %c0_i32 = arith.constant 0 : i32
    %c0_i32_0 = arith.constant 0 : i32
    return %arg0, %c0_i32, %arg1 : i32, i32, i32
  }
  func.func @transform_1(%arg0: i32, %arg1: i32) -> (i32, i32) {
    %c0_i32 = arith.constant 0 : i32
    %c0_i32_0 = arith.constant 0 : i32
    %c0_i32_1 = arith.constant 0 : i32
    return %c0_i32, %c0_i32_0 : i32, i32
  }
  func.func @transform_2(%arg0: i32, %arg1: i32) -> (i32, i32) {
    %c0_i32 = arith.constant 0 : i32
    %c0_i32_0 = arith.constant 0 : i32
    %c0_i32_1 = arith.constant 0 : i32
    return %c0_i32, %c0_i32_0 : i32, i32
  }
  func.func @transform_3(%arg0: i32, %arg1: i32) -> (i32, i32) {
    %c0_i32 = arith.constant 0 : i32
    %c0_i32_0 = arith.constant 0 : i32
    %c0_i32_1 = arith.constant 0 : i32
    return %c0_i32, %c0_i32_0 : i32, i32
  }
  func.func @transform_4(%arg0: i32, %arg1: i32) -> (i32, i32, i32) {
    %c0_i32 = arith.constant 0 : i32
    %c0_i32_0 = arith.constant 0 : i32
    return %arg0, %c0_i32, %arg1 : i32, i32, i32
  }
}

</mosaic_0001>

<bundles_post_ra>
// kernel: tpu_custom_call.1
= control target key start
LH: loop header
LB: loop body
LE: loop exit
PB: predicated region body
PF: predicated region fallthrough
CT: control target
= control target key end

     0   :  { %9 = vsyncpa [#allocation3], 0  ;;  %s3318_s0 = inlined_call_operand.hbm [shape: f32[2,4,2048], index: 0, kind: input, shape index: {}]   ;;  %s3319_s1 = inlined_call_operand.hbm [shape: f32[16,5], index: 1, kind: input, shape index: {}]   ;;  %s3320_s2 = inlined_call_operand.hbm [shape: f32[8,17], index: 2, kind: input, shape index: {}]   ;;  %s3321_s3 = inlined_call_operand.hbm [shape: f32[1,9], index: 3, kind: input, shape index: {}]   ;;  %s3322_s4 = inlined_call_operand.hbm [shape: f32[2,1,2048], index: 4, kind: output, shape index: {}]  }
   0x1   :  { %11 = vsyncpa [#allocation3 + $0x1], 0 }
   0x2   :  { %12 = vsyncpa [#allocation6], 0 }
   0x3   :  { %13 = vsyncpa [#allocation9], 0 }
   0x4   :  { %14 = vsyncpa [#allocation4], 0 }
   0x5   :  { %16 = vsyncpa [#allocation4 + $0x1], 0  ;;  %s2876_s15 = smov 0   ;;  %s2878_s16 = smov 0  }
   0x6   :  { %s2880_s17 = smov 0   ;;  %s2882_s18 = smov 0  }
   0x7   :  { %s2884_s19 = smov 0   ;;  %s2886_s20 = smov 0  }
   0x8 LB: > { %s2418_s21 = sadd.s32 4294967295, %s2837_s20   ;;  %s2419_s22 = sadd.s32 4294967294, %s2837_s20   ;;  %s2837_s20 = sphi %s2886_s20, %s22_s20   ;;  %s2833_s19 = sphi %s2884_s19, %s3349_s19   ;;  %s2829_s18 = sphi %s2882_s18, %s3348_s18   ;;  %s2825_s17 = sphi %s2880_s17, %s3347_s17   ;;  %s2821_s16 = sphi %s2878_s16, %s3346_s16   ;;  %s2817_s15 = sphi %s2876_s15, %s3345_s15  }
   0x9   : > { %p56_p0 = scmp.ne.s32.totalorder %s2821_s16, %s2817_s15  ;;  %p2910_p1 = scmp.eq.s32.totalorder %s2418_s21, 0 }
   0xa   : > { %p2914_p2 = scmp.eq.s32.totalorder %s2418_s21, 1  ;;  %p151_p3 = scmp.eq.s32.totalorder %s2419_s22, 1 }
   0xb   : > { %s3328_s23 = scalar_select %p2910_p1, 1, 0 }
   0xc   : > { %s3329_s24 = scalar_select %p2914_p2, 1, 0 }
   0xd   : > { %p2920_p4 = por %p2910_p1, %p56_p0  ;;  %p2420_p5 = scmp.ge.s32.totalorder %s2837_s20, 1 }
   0xe   : > { %p2925_p6 = por %p151_p3, %p56_p0  ;;  %p158_p7 = scmp.lt.s32.totalorder %s2837_s20, 3 }
   0xf   : > { %s3330_s25 = scalar_select %p2920_p4, 1, 0 }
  0x10   : > { %s3331_s26 = scalar_select %p2925_p6, 1, 0 }
  0x11   : > { %p2930_p8 = pnand %p2420_p5, %p158_p7  ;;  %s2839_s28 = smov [#allocation5]  }
  0x12   : > { %3332 = sst [smem:[#allocation15_spill]] %s3331_s26  ;;  %s170_s29 = sshll.u32 %s2839_s28, 4  ;;  %s2934_s29 = int_to_ptr.vmem [resolvable:$true] %s170_s29 }
  0x13   : > { %s3333_s27 = scalar_select %p2930_p8, 1, 0 }
  0x14   : > { %p2537_p9 = pneg %p2930_p8  ;;  %s2840_s5 = smov [#allocation7]  }
  0x15   : > { %s184_s6 = sshll.u32 %s2840_s5, 4  ;;  %s2841_s7 = smov [#allocation8]   ;;  %s2945_s6 = int_to_ptr.vmem [resolvable:$true] %s184_s6 }
  0x16   : > { %p2941_p11 = pnand %p2537_p9, %p2910_p1  ;;  %s2947_s8 = sshll.u32 %s2841_s7, 4  ;;  %s196_s8 = int_to_ptr.vmem [resolvable:$true] %s2947_s8 }
  0x17   : > { %s2633_s11 = scalar_lea.hbm %s3319_s1, 256 }
  0x18   : > { %p2634_p12 = scmp.ne.s32.totalorder %s3319_s1, %s2633_s11  ;;  %p2957_p13 = pneg %p2941_p11 }
  0x19   : > { %p2640_p5 = scmp.lt.u32.totalorder %s2633_s11, %s3319_s1 }
  0x1a   : > { %p2636_p0 = pnand %p2957_p13, %p2634_p12 }
  0x1c   : > { %p2637_p3 = pneg %p2636_p0 }
  0x1e   : > { %p2642_p7 = pnand %p2640_p5, %p2637_p3 }
  0x20   : > { %2645 = shalt.err (!%p2642_p7)
}
  0x21   : > { %s2646_s28 = scalar_lea.vmem %s2934_s29, 256  ;;  %p2654_p1 = scmp.lt.s32.totalorder %s2934_s29, %s2934_s29 }
  0x22   : > { %p2647_p9 = scmp.ne.s32.totalorder %s2934_s29, %s2646_s28  ;;  %p2655_p4 = scmp.lt.s32.totalorder %s2646_s28, %s2646_s28 }
  0x24   : > { %p2649_p10 = pnand %p2647_p9, %p2957_p13  ;;  %p2656_p12 = por %p2655_p4, %p2654_p1 }
  0x26   : > { %p2650_p6 = pneg %p2649_p10 }
  0x28   : > { %p2657_p0 = pnand %p2656_p12, %p2650_p6 }
  0x2a   : > { %2660 = shalt.err (!%p2657_p0)
}
  0x2b   : > { %s2842_s5 = smov 128   ;;  %s2843_s7 = smov 8  }
  0x2c   : > { %2540 = dma.hbm_to_vmem [thread:$0]  (!%p2941_p11), %s3319_s1, 256, %s2934_s29, [#allocation6], %s2842_s5, %s2842_s5, %s2843_s7  }
  0x2d   : > { %s2661_s13 = scalar_lea.hbm %s3320_s2, 128 }
  0x2e   : > { %p2662_p1 = scmp.ne.s32.totalorder %s3320_s2, %s2661_s13  ;;  %p2668_p10 = scmp.lt.u32.totalorder %s2661_s13, %s3320_s2 }
  0x30   : > { %p2664_p4 = pnand %p2662_p1, %p2957_p13 }
  0x32   : > { %p2665_p6 = pneg %p2664_p4 }
  0x34   : > { %p2670_p3 = pnand %p2668_p10, %p2665_p6 }
  0x36   : > { %2673 = shalt.err (!%p2670_p3)
}
  0x37   : > { %s2674_s29 = scalar_lea.vmem %s2945_s6, 128  ;;  %p2682_p12 = scmp.lt.s32.totalorder %s2945_s6, %s2945_s6 }
  0x38   : > { %p2675_p5 = scmp.ne.s32.totalorder %s2945_s6, %s2674_s29  ;;  %p2683_p0 = scmp.lt.s32.totalorder %s2674_s29, %s2674_s29 }
  0x3a   : > { %p2677_p7 = pnand %p2675_p5, %p2957_p13  ;;  %p2684_p1 = por %p2683_p0, %p2682_p12 }
  0x3c   : > { %p2678_p9 = pneg %p2677_p7 }
  0x3e   : > { %p2685_p4 = pnand %p2684_p1, %p2678_p9 }
  0x40   : > { %2688 = shalt.err (!%p2685_p4)
}
  0x41   : > { %2543 = dma.hbm_to_vmem [thread:$0]  (!%p2941_p11), %s3320_s2, 128, %s2945_s6, [#allocation6]  }
  0x42   : > { %s2689_s10 = scalar_lea.hbm %s3321_s3, 16 }
  0x43   : > { %p2690_p6 = scmp.ne.s32.totalorder %s3321_s3, %s2689_s10  ;;  %p2696_p5 = scmp.lt.u32.totalorder %s2689_s10, %s3321_s3 }
  0x45   : > { %p2692_p10 = pnand %p2690_p6, %p2957_p13 }
  0x47   : > { %p2693_p3 = pneg %p2692_p10 }
  0x49   : > { %p2698_p7 = pnand %p2696_p5, %p2693_p3 }
  0x4b   : > { %2701 = shalt.err (!%p2698_p7)
}
  0x4c   : > { %s2702_s22 = scalar_lea.vmem %s196_s8, 16  ;;  %s2709_s6 = scalar_lea.vmem %s196_s8, 32 }
  0x4d   : > { %p2703_p9 = scmp.ne.s32.totalorder %s196_s8, %s2702_s22  ;;  %p2710_p1 = scmp.lt.s32.totalorder %s196_s8, %s196_s8 }
  0x4e   : > { %p2711_p4 = scmp.lt.s32.totalorder %s2709_s6, %s2702_s22 }
  0x4f   : > { %p2705_p12 = pnand %p2703_p9, %p2957_p13 }
  0x50   : > { %p2712_p8 = por %p2711_p4, %p2710_p1 }
  0x51   : > { %p2706_p0 = pneg %p2705_p12 }
  0x53   : > { %p2713_p2 = pnand %p2712_p8, %p2706_p0 }
  0x55   : > { %2716 = shalt.err (!%p2713_p2)
}
  0x56   : > { %2546 = dma.hbm_to_vmem [thread:$0]  (!%p2941_p11), %s3321_s3, 16, %s196_s8, [#allocation9]  }
  0x57   : > { %s43_s14 = sadd.s32 1, %s2825_s17  ;;  %s34_s26 = sadd.s32 1, %s2833_s19 }
  0x58   : > { %p50_p2 = scmp.ne.s32.totalorder %s2825_s17, %s2821_s16  ;;  %p36_p8 = scmp.ge.s32.totalorder %s34_s26, 2 }
  0x59   : > { %p51_p13 = scmp.eq.s32.totalorder %s2837_s20, 0  ;;  %p3336_p6 = scmp.ne.s32.totalorder %s3329_s24, 0 }
  0x5a   : > { %p2558_p3 = scmp.lt.s32.totalorder %s2837_s20, 2  ;;  %s3351_s26 = smov (%p36_p8, %s34_s26), 0 }
  0x5b   : > { %p3027_p10 = por %p3336_p6, %p50_p2  ;;  %p52_p5 = por %p51_p13, %p50_p2 }
  0x5c   : > { %s206_s5 = sand.u32 1, %s2825_s17   ;;  %s38_s7 = ssub.s32 %s2833_s19, %s3351_s26 }
  0x5d   : > { %p41_p7 = scmp.eq.s32.totalorder %s38_s7, 0  ;;  %s2425_s8 = sshll.u32 %s206_s5, 6 }
  0x5e   : > { %s2487_s9 = sshll.u32 %s2833_s19, 10  ;;  %s210_s13 = scalar_lea.vmem [#allocation2], %s2425_s8 }
  0x5f   : > { %s3039_s10 = scalar_select %p41_p7, %s2825_s17, %s43_s14  }
  0x60   : > { %s3044_s24 = scalar_lea.hbm %s3318_s0, %s2487_s9  ;;  %s220_s21 = sshll.u32 %s210_s13, 4  ;;  %s3046_s21 = int_to_ptr.vmem [resolvable:$true] %s220_s21 }
  0x61   : > { %p3050_p11 = pnand %p2558_p3, %p52_p5  ;;  %s207_s6 = scalar_lea.sflag [#allocation3], %s206_s5 }
  0x62   : > { %s2717_s28 = scalar_lea.hbm %s3044_s24, 1024  ;;  %s2722_s7 = scalar_lea.hbm %s3318_s0, 2048 }
  0x63   : > { %p2718_p9 = scmp.ne.s32.totalorder %s3044_s24, %s2717_s28  ;;  %p2719_p12 = pneg %p3050_p11 }
  0x64   : > { %p2723_p4 = scmp.lt.u32.totalorder %s3044_s24, %s3318_s0  ;;  %p2724_p2 = scmp.lt.u32.totalorder %s2722_s7, %s2717_s28 }
  0x65   : > { %p2720_p0 = pnand %p2719_p12, %p2718_p9  ;;  %p2726_p13 = scmp.lt.u32.totalorder %s2717_s28, %s3044_s24 }
  0x66   : > { %p2725_p8 = por %p2724_p2, %p2723_p4 }
  0x67   : > { %p2721_p1 = pneg %p2720_p0 }
  0x68   : > { %p2727_p6 = por %p2726_p13, %p2725_p8 }
  0x6a   : > { %p2728_p3 = pnand %p2727_p6, %p2721_p1 }
  0x6c   : > { %2731 = shalt.err (!%p2728_p3)
}
  0x6d   : > { %s2732_s5 = scalar_lea.vmem %s3046_s21, 1024  ;;  %s2844_s11 = smov [#allocation2]  }
  0x6e   : > { %p2733_p5 = scmp.ne.s32.totalorder %s3046_s21, %s2732_s5  ;;  %s2737_s12 = sshll.u32 %s2844_s11, 4  ;;  %s2738_s12 = int_to_ptr.vmem [resolvable:$false] %s2737_s12 }
  0x6f   : > { %s2739_s13 = scalar_lea.vmem %s2738_s12, 2048  ;;  %p2740_p0 = scmp.lt.s32.totalorder %s3046_s21, %s2738_s12 }
  0x70   : > { %p2735_p7 = pnand %p2733_p5, %p2719_p12  ;;  %p2741_p4 = scmp.lt.s32.totalorder %s2739_s13, %s2732_s5 }
  0x72   : > { %p2736_p9 = pneg %p2735_p7  ;;  %p2742_p2 = por %p2741_p4, %p2740_p0 }
  0x74   : > { %p2743_p8 = pnand %p2742_p2, %p2736_p9 }
  0x76   : > { %2746 = shalt.err (!%p2743_p8)
}
  0x77   : > { %2550 = dma.hbm_to_vmem [thread:$0]  (!%p3050_p11), %s3044_s24, 1024, %s3046_s21, %s207_s6  }
  0x78   : > { %p3339_p1 = scmp.ne.s32.totalorder %s3333_s27, 0 }
  0x79   : > { %s3082_s28 = sand.u32 (!%p3339_p1), 1, %s2821_s16   ;;  %p3340_p12 = scmp.ne.s32.totalorder (!%p3339_p1), %s3330_s25, 0 }
  0x7a   : > { %229 = sbr.rel (%p3339_p1) target bundleno = 850 (0x352), region = 36  ;;  %s2429_s29 = sshll.u32 (!%p3339_p1), %s3082_s28, 6 }
  0x7b   : > { %s232_s14 = scalar_lea.sflag (!%p3339_p1), [#allocation3], %s3082_s28  ;;  %s3086_s7 = scalar_lea.vmem (!%p3339_p1), [#allocation2], %s2429_s29 }
  0x81   : > { %2800 = dma.done.wait (%p3340_p12), %s232_s14, 1024  }
  0x82   : > { %2802 = vsyncadd (%p3340_p12), %s232_s14, 4294966272  ;;  %p3341_p11 = scmp.ne.s32.totalorder %s3328_s23, 0 }
  0x84   : > { %2804 = dma.done.wait (%p3341_p11), [#allocation6], 384  }
  0x85   : > { %2806 = vsyncadd (%p3341_p11), [#allocation6], 4294966912 }
  0x86   : > { %2808 = dma.done.wait (%p3341_p11), [#allocation9], 16  }
  0x87   : > { %2810 = vsyncadd (%p3341_p11), [#allocation9], 4294967280  ;;  %v2845_v0 = vmov 0.0   ;;  %v2846_v1 = vmov 4   ;;  %v274_v2 = vld [vmem:[%s3086_s7] sm:$0xff]  ;;  %vm315_vm0 = vcmask 1043456  }
  0x88   : > { %412 = vmatprep.mubr.f32.mxu0 %v2845_v0  ;;  %489 = vmatprep.mubr.f32.mxu1 %v2845_v0  ;;  %v275_v3 = vld [vmem:[%s3086_s7 + $0x8] sm:$0xff]  ;;  %v282_v4 = vld [vmem:[#allocation5] sm:$0xff]  ;;  %v302_v5 = vcombine.high %v274_v2, %v274_v2  ;;  %v276_v7 = vld [vmem:[%s3086_s7 + $0x10] sm:$0xff]  ;;  %vm310_vm1 = vcmask 31744   ;;  %v2847_v21 = vmov 16   ;;  %vm1002_vm2 = vcmask 130048  }
  0x89   : > { %2621 = vset.pattern.permute.xlu0 %v2846_v1  ;;  %v303_v6 = vcombine.high %v275_v3, %v275_v3  ;;  %v277_v8 = vld [vmem:[%s3086_s7 + $0x18] sm:$0xff]  ;;  %v304_v9 = vcombine.high %v276_v7, %v276_v7  ;;  %v278_v11 = vld [vmem:[%s3086_s7 + $0x20] sm:$0xff]  ;;  %v279_v12 = vld [vmem:[%s3086_s7 + $0x28] sm:$0xff]  ;;  %2622 = vset.pattern.permute.xlu1 %v2847_v21  ;;  %vm1599_vm3 = vcmask 64512   ;;  %s2433_s23 = sshll.u32 %s3082_s28, 4  ;;  %s2488_s27 = sshll.u32 %s2829_s18, 8 }
  0x8a   : > { %286 = vperm.xlu0 %2621, %v282_v4   ;;  %v305_v10 = vcombine.high %v277_v8, %v277_v8  ;;  %2434 = vmatprep.subr.msk.mxu0 %vm315_vm0, %v302_v5  ;;  %v283_v13 = vld [vmem:[#allocation5 + $0x8] sm:$0xff]  ;;  %v306_v14 = vcombine.high %v278_v11, %v278_v11  ;;  %v307_v15 = vcombine.high %v279_v12, %v279_v12  ;;  %v280_v16 = vld [vmem:[%s3086_s7 + $0x30] sm:$0xff]  ;;  %v281_v17 = vld [vmem:[%s3086_s7 + $0x38] sm:$0xff]  ;;  %s271_s25 = scalar_lea.vmem [#allocation10], %s2433_s23  ;;  %s3269_s6 = scalar_lea.hbm %s3322_s4, %s2488_s27 }
  0x8b   : > { %2438 = vmatprep.subr.msk.mxu1 %vm315_vm0, %v303_v6  ;;  %2435 = vmatpush1.msk.msra.mxu0 %vm315_vm0, %v274_v2  ;;  %v308_v18 = vcombine.high %v280_v16, %v280_v16  ;;  %v309_v19 = vcombine.high %v281_v17, %v281_v17  ;;  %v3158_v20 = vld [vmem:[#allocation7] sm:$0xff]  ;;  %s2305_s24 = sshll.u32 %s271_s25, 4  ;;  %s2289_s8 = scalar_lea.sflag [#allocation4], %s3082_s28  ;;  %s3271_s24 = int_to_ptr.vmem [resolvable:$true] %s2305_s24 }
  0x8c   : > { %2439 = vmatpush1.msk.msra.mxu1 %vm315_vm0, %v275_v3  ;;  %2436 = vmatmul.mubr.msk.f32.vlgmr.msra.gmra.mrb[0].mxu0 %vm310_vm1, %v282_v4  ;;  %s2747_s9 = scalar_lea.vmem %s3271_s24, 256  ;;  %s2850_s18 = smov [#allocation10]  }
  0x8d   : > { %2440 = vmatmul.mubr.msk.f32.vlgmr.msra.gmra.mrb[0].mxu1 %vm310_vm1, %v282_v4  ;;  %2442 = vmatprep.subr.msk.mxu0 %vm315_vm0, %v304_v9  ;;  %p2748_p13 = scmp.ne.s32.totalorder %s3271_s24, %s2747_s9  ;;  %s2751_s5 = sshll.u32 %s2850_s18, 4  ;;  %s2752_s5 = int_to_ptr.vmem [resolvable:$false] %s2751_s5 }
  0x8e   : > { %2446 = vmatprep.subr.msk.mxu1 %vm315_vm0, %v305_v10  ;;  %418 = vmatprep.mubr.f32.mxu0 %v2845_v0  ;;  %s2753_s11 = scalar_lea.vmem %s2752_s5, 512  ;;  %p2754_p5 = scmp.lt.s32.totalorder %s3271_s24, %s2752_s5 }
  0x8f   : > { %495 = vmatprep.mubr.f32.mxu1 %v2845_v0  ;;  %2443 = vmatpush1.msk.msra.mxu0 %vm315_vm0, %v276_v7  ;;  %p2749_p6 = pnand %p2748_p13, %p3027_p10  ;;  %p2755_p7 = scmp.lt.s32.totalorder %s2753_s11, %s2747_s9 }
  0x90   : > { %2447 = vmatpush1.msk.msra.mxu1 %vm315_vm0, %v277_v8  ;;  %2437 = vmatmul.mubr.msk.f32.gmra.mrb[2].mxu0 %vm310_vm1, %v283_v13 }
  0x91   : > { %2441 = vmatmul.mubr.msk.f32.gmra.mrb[2].mxu1 %vm310_vm1, %v283_v13  ;;  %566 = vmatprep.mubr.f32.mxu0 %v2845_v0  ;;  %p2750_p3 = pneg %p2749_p6  ;;  %p2756_p9 = por %p2755_p7, %p2754_p5 }
  0x92   : > { %643 = vmatprep.mubr.f32.mxu1 %v2845_v0  ;;  %2450 = vmatprep.subr.msk.mxu0 %vm315_vm0, %v306_v14 }
  0x93   : > { %2454 = vmatprep.subr.msk.mxu1 %vm315_vm0, %v307_v15  ;;  %291 = vperm.xlu0 %2621, %v283_v13   ;;  %p2757_p0 = pnand %p2756_p9, %p2750_p3 }
  0x94   : > { %2444 = vmatmul.mubr.msk.f32.vlgmr.msra.gmra.mrb[4].mxu0 %vm310_vm1, %v282_v4  ;;  %999 = vperm.xlu1 %2622, %v3158_v20  }
  0x95   : > { %2448 = vmatmul.mubr.msk.f32.vlgmr.msra.gmra.mrb[4].mxu1 %vm310_vm1, %v282_v4  ;;  %572 = vmatprep.mubr.f32.mxu0 %v2845_v0 }
  0x96   : > { %649 = vmatprep.mubr.f32.mxu1 %v2845_v0  ;;  %2451 = vmatpush1.msk.msra.mxu0 %vm315_vm0, %v278_v11 }
  0x97   : > { %2455 = vmatpush1.msk.msra.mxu1 %vm315_vm0, %v279_v12  ;;  %2458 = vmatprep.subr.msk.mxu0 %vm315_vm0, %v308_v18 }
  0x98   : > { %2462 = vmatprep.subr.msk.mxu1 %vm315_vm0, %v309_v19  ;;  %2445 = vmatmul.mubr.msk.f32.gmra.mrb[6].mxu0 %vm310_vm1, %v283_v13 }
  0x99   : > { %2449 = vmatmul.mubr.msk.f32.gmra.mrb[6].mxu1 %vm310_vm1, %v283_v13  ;;  %720 = vmatprep.mubr.f32.mxu0 %v2845_v0 }
  0x9a   : > { %797 = vmatprep.mubr.f32.mxu1 %v2845_v0 }
  0x9c   : > { %2452 = vmatmul.mubr.msk.f32.vlgmr.msra.gmra.mrb[8].mxu0 %vm310_vm1, %v282_v4 }
  0x9d   : > { %2456 = vmatmul.mubr.msk.f32.vlgmr.msra.gmra.mrb[8].mxu1 %vm310_vm1, %v282_v4  ;;  %726 = vmatprep.mubr.f32.mxu0 %v2845_v0 }
  0x9e   : > { %803 = vmatprep.mubr.f32.mxu1 %v2845_v0  ;;  %2459 = vmatpush1.msk.msra.mxu0 %vm315_vm0, %v280_v16 }
  0x9f   : > { %2463 = vmatpush1.msk.msra.mxu1 %vm315_vm0, %v281_v17 }
  0xa0   : > { %2453 = vmatmul.mubr.msk.f32.gmra.mrb[10].mxu0 %vm310_vm1, %v283_v13 }
  0xa1   : > { %2457 = vmatmul.mubr.msk.f32.gmra.mrb[10].mxu1 %vm310_vm1, %v283_v13  ;;  %874 = vmatprep.mubr.f32.mxu0 %v2845_v0 }
  0xa2   : > { %951 = vmatprep.mubr.f32.mxu1 %v2845_v0 }
  0xa4   : > { %2460 = vmatmul.mubr.msk.f32.vlgmr.msra.gmra.mrb[12].mxu0 %vm310_vm1, %v282_v4 }
  0xa5   : > { %2464 = vmatmul.mubr.msk.f32.vlgmr.msra.gmra.mrb[12].mxu1 %vm310_vm1, %v282_v4  ;;  %880 = vmatprep.mubr.f32.mxu0 %v2845_v0 }
  0xa6   : > { %957 = vmatprep.mubr.f32.mxu1 %v2845_v0 }
  0xa8   : > { %2461 = vmatmul.mubr.msk.f32.gmra.mrb[14].mxu0 %vm310_vm1, %v283_v13 }
  0xa9   : > { %2465 = vmatmul.mubr.msk.f32.gmra.mrb[14].mxu1 %vm310_vm1, %v283_v13  ;;  %1069 = vmatprep.mubr.f32.mxu0 %v2845_v0 }
  0xaa   : > { %1140 = vmatprep.mubr.f32.mxu1 %v2845_v0 }
 0x109   : > { %v3161_v22 = vpop.permute.xlu0 %286 }
 0x112   : > { %v3163_v27 = vpop.permute.xlu0 %291 }
 0x15f   : > { %v414_v23 = vpop.f32.mrb[0].mxu0 }
 0x160   : > { %v491_v24 = vpop.f32.mrb[0].mxu1  ;;  %v416_v25 = vpop.f32.mrb[1].mxu0  ;;  %v415_v28 = vadd.f32 %v414_v23, %v3161_v22 }
 0x161   : > { %v493_v26 = vpop.f32.mrb[1].mxu1  ;;  %v492_v29 = vadd.f32 %v491_v24, %v3161_v22  ;;  %v417_v30 = vadd.f32 %v416_v25, %v3161_v22 }
 0x162   : > { %v494_v31 = vadd.f32 %v493_v26, %v3161_v22  ;;  %v964_v40 = vmax.f32 %v415_v28, 0.0 }
 0x163   : > { %v420_v32 = vpop.f32.mrb[2].mxu0  ;;  %v966_v41 = vmax.f32 %v492_v29, 0.0  ;;  %v965_v44 = vmax.f32 %v417_v30, 0.0 }
 0x164   : > { %v497_v33 = vpop.f32.mrb[2].mxu1  ;;  %v421_v34 = vadd.f32 %v420_v32, %v3163_v27  ;;  %v422_v36 = vpop.f32.mrb[3].mxu0  ;;  %v967_v45 = vmax.f32 %v494_v31, 0.0 }
 0x165   : > { %v498_v35 = vadd.f32 %v497_v33, %v3163_v27  ;;  %v499_v37 = vpop.f32.mrb[3].mxu1  ;;  %v423_v38 = vadd.f32 %v422_v36, %v3163_v27 }
 0x166   : > { %v500_v39 = vadd.f32 %v499_v37, %v3163_v27  ;;  %v980_v42 = vmax.f32 %v421_v34, 0.0 }
 0x167   : > { %v982_v43 = vmax.f32 %v498_v35, 0.0  ;;  %v981_v46 = vmax.f32 %v423_v38, 0.0  ;;  %v568_v48 = vpop.f32.mrb[4].mxu0 }
 0x168   : > { %v983_v47 = vmax.f32 %v500_v39, 0.0  ;;  %v645_v49 = vpop.f32.mrb[4].mxu1  ;;  %v2491_v50 = vpack.c.bf16 %v980_v42, %v964_v40  ;;  %v570_v52 = vpop.f32.mrb[5].mxu0  ;;  %v569_v56 = vadd.f32 %v568_v48, %v3161_v22 }
 0x169   : > { %v2495_v51 = vpack.c.bf16 %v982_v43, %v966_v41  ;;  %v647_v53 = vpop.f32.mrb[5].mxu1  ;;  %v2489_v54 = vpack.c.bf16 %v981_v46, %v965_v44  ;;  %v646_v57 = vadd.f32 %v645_v49, %v3161_v22  ;;  %v571_v58 = vadd.f32 %v570_v52, %v3161_v22 }
 0x16a   : > { %v2493_v55 = vpack.c.bf16 %v983_v47, %v967_v45  ;;  %v648_v59 = vadd.f32 %v647_v53, %v3161_v22  ;;  %v968_v5 = vmax.f32 %v569_v56, 0.0 }
 0x16b   : > { %v574_v60 = vpop.f32.mrb[6].mxu0  ;;  %2490 = vmatprep.subr.bf16.mxu0 %v2489_v54  ;;  %v970_v6 = vmax.f32 %v646_v57, 0.0  ;;  %v969_v9 = vmax.f32 %v571_v58, 0.0 }
 0x16c   : > { %v651_v61 = vpop.f32.mrb[6].mxu1  ;;  %2494 = vmatprep.subr.bf16.mxu1 %v2493_v55  ;;  %v575_v62 = vadd.f32 %v574_v60, %v3163_v27  ;;  %v576_v1 = vpop.f32.mrb[7].mxu0  ;;  %2492 = vmatpush1.bf16.msra.mxu0 %v2491_v50  ;;  %v971_v10 = vmax.f32 %v648_v59, 0.0 }
 0x16d   : > { %v652_v63 = vadd.f32 %v651_v61, %v3163_v27  ;;  %v653_v2 = vpop.f32.mrb[7].mxu1  ;;  %2496 = vmatpush1.bf16.msra.mxu1 %v2495_v51  ;;  %v577_v3 = vadd.f32 %v576_v1, %v3163_v27 }
 0x16e   : > { %v654_v4 = vadd.f32 %v653_v2, %v3163_v27  ;;  %v984_v7 = vmax.f32 %v575_v62, 0.0 }
 0x16f   : > { %v986_v8 = vmax.f32 %v652_v63, 0.0  ;;  %v985_v11 = vmax.f32 %v577_v3, 0.0  ;;  %v722_v13 = vpop.f32.mrb[8].mxu0  ;;  %2466 = vmatmul.mubr.msk.f32.vlgmr.msra.gmra.mrb[16].mxu0 %vm1002_vm2, %v3158_v20 }
 0x170   : > { %v987_v12 = vmax.f32 %v654_v4, 0.0  ;;  %v799_v14 = vpop.f32.mrb[8].mxu1  ;;  %2467 = vmatmul.mubr.msk.f32.vlgmr.msra.gmra.mrb[16].mxu1 %vm1002_vm2, %v3158_v20  ;;  %v2499_v15 = vpack.c.bf16 %v984_v7, %v968_v5  ;;  %v724_v17 = vpop.f32.mrb[9].mxu0  ;;  %1211 = vmatprep.mubr.f32.mxu0 %v2845_v0  ;;  %v723_v23 = vadd.f32 %v722_v13, %v3161_v22 }
 0x171   : > { %v2503_v16 = vpack.c.bf16 %v986_v8, %v970_v6  ;;  %v801_v18 = vpop.f32.mrb[9].mxu1  ;;  %v2497_v19 = vpack.c.bf16 %v985_v11, %v969_v9  ;;  %1282 = vmatprep.mubr.f32.mxu1 %v2845_v0  ;;  %v800_v24 = vadd.f32 %v799_v14, %v3161_v22  ;;  %v725_v25 = vadd.f32 %v724_v17, %v3161_v22  ;;  %v3221_v11 = vld [vmem:[#allocation8] sm:$0x1]  ;;  %v3224_v13 = vpop.permute.xlu1 %999 }
 0x172   : > { %v2501_v21 = vpack.c.bf16 %v987_v12, %v971_v10  ;;  %v802_v26 = vadd.f32 %v801_v18, %v3161_v22  ;;  %v972_v36 = vmax.f32 %v723_v23, 0.0  ;;  %v2848_v12 = vmov 8  }
 0x173   : > { %v728_v28 = vpop.f32.mrb[10].mxu0  ;;  %2498 = vmatprep.subr.bf16.mxu0 %v2497_v19  ;;  %v974_v37 = vmax.f32 %v800_v24, 0.0  ;;  %v973_v40 = vmax.f32 %v725_v25, 0.0  ;;  %2623 = vset.pattern.permute.xlu1 %v2848_v12 }
 0x174   : > { %v805_v29 = vpop.f32.mrb[10].mxu1  ;;  %2502 = vmatprep.subr.bf16.mxu1 %v2501_v21  ;;  %v729_v30 = vadd.f32 %v728_v28, %v3163_v27  ;;  %v730_v32 = vpop.f32.mrb[11].mxu0  ;;  %2500 = vmatpush1.bf16.msra.mxu0 %v2499_v15  ;;  %v975_v41 = vmax.f32 %v802_v26, 0.0 }
 0x175   : > { %v806_v31 = vadd.f32 %v805_v29, %v3163_v27  ;;  %v807_v33 = vpop.f32.mrb[11].mxu1  ;;  %2504 = vmatpush1.bf16.msra.mxu1 %v2503_v16  ;;  %v731_v34 = vadd.f32 %v730_v32, %v3163_v27  ;;  %2624 = vset.pattern.permute.xlu0 %v2848_v12 }
 0x176   : > { %v808_v35 = vadd.f32 %v807_v33, %v3163_v27  ;;  %v988_v38 = vmax.f32 %v729_v30, 0.0  ;;  %1592 = vperm.xlu1 %2623, %v3221_v11  }
 0x177   : > { %v990_v39 = vmax.f32 %v806_v31, 0.0  ;;  %v989_v42 = vmax.f32 %v731_v34, 0.0  ;;  %v876_v44 = vpop.f32.mrb[12].mxu0  ;;  %2468 = vmatmul.mubr.msk.f32.vlgmr.msra.gmra.mrb[18].mxu0 %vm1002_vm2, %v3158_v20 }
 0x178   : > { %v991_v43 = vmax.f32 %v808_v35, 0.0  ;;  %v953_v45 = vpop.f32.mrb[12].mxu1  ;;  %2469 = vmatmul.mubr.msk.f32.vlgmr.msra.gmra.mrb[18].mxu1 %vm1002_vm2, %v3158_v20  ;;  %v2507_v46 = vpack.c.bf16 %v988_v38, %v972_v36  ;;  %v878_v48 = vpop.f32.mrb[13].mxu0  ;;  %1353 = vmatprep.mubr.f32.mxu0 %v2845_v0  ;;  %v877_v52 = vadd.f32 %v876_v44, %v3161_v22 }
 0x179   : > { %v2511_v47 = vpack.c.bf16 %v990_v39, %v974_v37  ;;  %v955_v49 = vpop.f32.mrb[13].mxu1  ;;  %v2505_v50 = vpack.c.bf16 %v989_v42, %v973_v40  ;;  %1424 = vmatprep.mubr.f32.mxu1 %v2845_v0  ;;  %v954_v53 = vadd.f32 %v953_v45, %v3161_v22  ;;  %v879_v54 = vadd.f32 %v878_v48, %v3161_v22 }
 0x17a   : > { %v2509_v51 = vpack.c.bf16 %v991_v43, %v975_v41  ;;  %v956_v55 = vadd.f32 %v955_v49, %v3161_v22  ;;  %v976_v1 = vmax.f32 %v877_v52, 0.0 }
 0x17b   : > { %v882_v56 = vpop.f32.mrb[14].mxu0  ;;  %2506 = vmatprep.subr.bf16.mxu0 %v2505_v50  ;;  %v978_v2 = vmax.f32 %v954_v53, 0.0  ;;  %v977_v4 = vmax.f32 %v879_v54, 0.0 }
 0x17c   : > { %v959_v57 = vpop.f32.mrb[14].mxu1  ;;  %2510 = vmatprep.subr.bf16.mxu1 %v2509_v51  ;;  %v883_v58 = vadd.f32 %v882_v56, %v3163_v27  ;;  %v884_v60 = vpop.f32.mrb[15].mxu0  ;;  %2508 = vmatpush1.bf16.msra.mxu0 %v2507_v46  ;;  %v979_v5 = vmax.f32 %v956_v55, 0.0 }
 0x17d   : > { %v960_v59 = vadd.f32 %v959_v57, %v3163_v27  ;;  %v961_v61 = vpop.f32.mrb[15].mxu1  ;;  %2512 = vmatpush1.bf16.msra.mxu1 %v2511_v47  ;;  %v885_v62 = vadd.f32 %v884_v60, %v3163_v27 }
 0x17e   : > { %v962_v63 = vadd.f32 %v961_v61, %v3163_v27  ;;  %v992_v3 = vmax.f32 %v883_v58, 0.0 }
 0x17f   : > { %v994_v22 = vmax.f32 %v960_v59, 0.0  ;;  %v993_v6 = vmax.f32 %v885_v62, 0.0  ;;  %2470 = vmatmul.mubr.msk.f32.vlgmr.msra.gmra.mrb[20].mxu0 %vm1002_vm2, %v3158_v20 }
 0x180   : > { %v995_v7 = vmax.f32 %v962_v63, 0.0  ;;  %2471 = vmatmul.mubr.msk.f32.vlgmr.msra.gmra.mrb[20].mxu1 %vm1002_vm2, %v3158_v20  ;;  %v2515_v8 = vpack.c.bf16 %v992_v3, %v976_v1  ;;  %1495 = vmatprep.mubr.f32.mxu0 %v2845_v0  ;;  %v1595_v1 = vlaneseq  ;;  %v2849_v3 = vmov 1966171168  }
 0x181   : > { %v2519_v9 = vpack.c.bf16 %v994_v22, %v978_v2  ;;  %1566 = vmatprep.mubr.f32.mxu1 %v2845_v0  ;;  %v2513_v27 = vpack.c.bf16 %v993_v6, %v977_v4  ;;  %v2191_v22 = vunpack.c.l.s4 %v2849_v3 }
 0x182   : > { %v2517_v10 = vpack.c.bf16 %v995_v7, %v979_v5 }
 0x183   : > { %2514 = vmatprep.subr.bf16.mxu0 %v2513_v27  ;;  %v2192_v6 = vunpack.c.0.s8 %v2191_v22 }
 0x184   : > { %2518 = vmatprep.subr.bf16.mxu1 %v2517_v10  ;;  %2516 = vmatpush1.bf16.msra.mxu0 %v2515_v8 }
 0x185   : > { %2520 = vmatpush1.bf16.msra.mxu1 %v2519_v9 }
 0x187   : > { %2472 = vmatmul.mubr.msk.f32.vlgmr.msra.gmra.mrb[22].mxu0 %vm1002_vm2, %v3158_v20 }
 0x188   : > { %2473 = vmatmul.mubr.msk.f32.vlgmr.msra.gmra.mrb[22].mxu1 %vm1002_vm2, %v3158_v20  ;;  %1666 = vmatprep.mubr.f32.mxu0 %v2845_v0 }
 0x189   : > { %1737 = vmatprep.mubr.f32.mxu1 %v2845_v0 }
 0x1f5   : > { %v1593_v4 = vpop.permute.xlu1 %1592 }
 0x242   : > { %v1071_v14 = vpop.f32.mrb[16].mxu0 }
 0x243   : > { %v1142_v15 = vpop.f32.mrb[16].mxu1  ;;  %v1073_v16 = vpop.f32.mrb[17].mxu0  ;;  %v1072_v18 = vadd.f32 %v1071_v14, %v3224_v13 }
 0x244   : > { %v1144_v17 = vpop.f32.mrb[17].mxu1  ;;  %v1143_v20 = vadd.f32 %v1142_v15, %v3224_v13  ;;  %v1074_v19 = vadd.f32 %v1073_v16, %v3224_v13 }
 0x245   : > { %v1145_v21 = vadd.f32 %v1144_v17, %v3224_v13  ;;  %v1573_v23 = vmax.f32 %v1072_v18, 0.0 }
 0x246   : > { %v1575_v24 = vmax.f32 %v1143_v20, 0.0  ;;  %v1574_v25 = vmax.f32 %v1074_v19, 0.0 }
 0x247   : > { %v1576_v26 = vmax.f32 %v1145_v21, 0.0 }
 0x248   : > { %1602 = vmatprep.subr.mxu0 %v1574_v25 }
 0x249   : > { %1673 = vmatprep.subr.mxu1 %v1576_v26  ;;  %1603 = vmatpush1.msra.mxu0 %v1573_v23 }
 0x24a   : > { %1674 = vmatpush1.msra.mxu1 %v1575_v24  ;;  %v1213_v28 = vpop.f32.mrb[18].mxu0  ;;  %2474 = vmatmul.mubr.msk.f32.vlgmr.msra.gmra.mrb[24].mxu0 %vm1599_vm3, %v3221_v11 }
 0x24b   : > { %v1284_v29 = vpop.f32.mrb[18].mxu1  ;;  %2475 = vmatmul.mubr.msk.f32.vlgmr.msra.gmra.mrb[24].mxu1 %vm1599_vm3, %v3221_v11  ;;  %v1214_v30 = vadd.f32 %v1213_v28, %v3224_v13  ;;  %v1215_v32 = vpop.f32.mrb[19].mxu0  ;;  %1808 = vmatprep.mubr.f32.mxu0 %v2845_v0 }
 0x24c   : > { %v1285_v31 = vadd.f32 %v1284_v29, %v3224_v13  ;;  %v1286_v33 = vpop.f32.mrb[19].mxu1  ;;  %1879 = vmatprep.mubr.f32.mxu1 %v2845_v0  ;;  %v1216_v34 = vadd.f32 %v1215_v32, %v3224_v13 }
 0x24d   : > { %v1287_v35 = vadd.f32 %v1286_v33, %v3224_v13  ;;  %v1577_v36 = vmax.f32 %v1214_v30, 0.0 }
 0x24e   : > { %v1579_v37 = vmax.f32 %v1285_v31, 0.0  ;;  %v1578_v38 = vmax.f32 %v1216_v34, 0.0 }
 0x24f   : > { %v1580_v39 = vmax.f32 %v1287_v35, 0.0 }
 0x250   : > { %1744 = vmatprep.subr.mxu0 %v1578_v38 }
 0x251   : > { %1815 = vmatprep.subr.mxu1 %v1580_v39  ;;  %1745 = vmatpush1.msra.mxu0 %v1577_v36 }
 0x252   : > { %1816 = vmatpush1.msra.mxu1 %v1579_v37  ;;  %v1355_v40 = vpop.f32.mrb[20].mxu0  ;;  %2476 = vmatmul.mubr.msk.f32.vlgmr.msra.gmra.mrb[26].mxu0 %vm1599_vm3, %v3221_v11 }
 0x253   : > { %v1426_v41 = vpop.f32.mrb[20].mxu1  ;;  %2477 = vmatmul.mubr.msk.f32.vlgmr.msra.gmra.mrb[26].mxu1 %vm1599_vm3, %v3221_v11  ;;  %v1356_v42 = vadd.f32 %v1355_v40, %v3224_v13  ;;  %v1357_v44 = vpop.f32.mrb[21].mxu0  ;;  %1950 = vmatprep.mubr.f32.mxu0 %v2845_v0 }
 0x254   : > { %v1427_v43 = vadd.f32 %v1426_v41, %v3224_v13  ;;  %v1428_v45 = vpop.f32.mrb[21].mxu1  ;;  %2021 = vmatprep.mubr.f32.mxu1 %v2845_v0  ;;  %v1358_v46 = vadd.f32 %v1357_v44, %v3224_v13 }
 0x255   : > { %v1429_v47 = vadd.f32 %v1428_v45, %v3224_v13  ;;  %v1581_v50 = vmax.f32 %v1356_v42, 0.0 }
 0x256   : > { %v1582_v48 = vmax.f32 %v1358_v46, 0.0  ;;  %v1583_v51 = vmax.f32 %v1427_v43, 0.0 }
 0x257   : > { %v1584_v49 = vmax.f32 %v1429_v47, 0.0 }
 0x258   : > { %1886 = vmatprep.subr.mxu0 %v1582_v48 }
 0x259   : > { %1957 = vmatprep.subr.mxu1 %v1584_v49  ;;  %1887 = vmatpush1.msra.mxu0 %v1581_v50 }
 0x25a   : > { %1958 = vmatpush1.msra.mxu1 %v1583_v51  ;;  %v1497_v52 = vpop.f32.mrb[22].mxu0  ;;  %2478 = vmatmul.mubr.msk.f32.vlgmr.msra.gmra.mrb[28].mxu0 %vm1599_vm3, %v3221_v11 }
 0x25b   : > { %v1568_v53 = vpop.f32.mrb[22].mxu1  ;;  %2479 = vmatmul.mubr.msk.f32.vlgmr.msra.gmra.mrb[28].mxu1 %vm1599_vm3, %v3221_v11  ;;  %v1498_v54 = vadd.f32 %v1497_v52, %v3224_v13  ;;  %v1499_v56 = vpop.f32.mrb[23].mxu0  ;;  %2092 = vmatprep.mubr.f32.mxu0 %v2845_v0 }
 0x25c   : > { %v1569_v55 = vadd.f32 %v1568_v53, %v3224_v13  ;;  %v1570_v57 = vpop.f32.mrb[23].mxu1  ;;  %2163 = vmatprep.mubr.f32.mxu1 %v2845_v0  ;;  %v1500_v58 = vadd.f32 %v1499_v56, %v3224_v13  ;;  %v1596_v0 = vshrl.u32 %v1595_v1, 7 }
 0x25d   : > { %v1571_v59 = vadd.f32 %v1570_v57, %v3224_v13  ;;  %v1585_v62 = vmax.f32 %v1498_v54, 0.0 }
 0x25e   : > { %v1586_v60 = vmax.f32 %v1500_v58, 0.0  ;;  %v1587_v63 = vmax.f32 %v1569_v55, 0.0  ;;  %v1597_v2 = vsub.s32 0, %v1596_v0  ;;  %v2195_v13 = vsub.s32 %v2192_v6, %v1596_v0 }
 0x25f   : > { %v1588_v61 = vmax.f32 %v1571_v59, 0.0 }
 0x260   : > { %2028 = vmatprep.subr.mxu0 %v1586_v60  ;;  %v1598_v5 = vrot.slane %v1593_v4, %v1597_v2 }
 0x261   : > { %2099 = vmatprep.subr.mxu1 %v1588_v61  ;;  %2029 = vmatpush1.msra.mxu0 %v1585_v62 }
 0x262   : > { %2100 = vmatpush1.msra.mxu1 %v1587_v63  ;;  %2480 = vmatmul.mubr.msk.f32.vlgmr.msra.gmra.mrb[30].mxu0 %vm1599_vm3, %v3221_v11 }
 0x263   : > { %2481 = vmatmul.mubr.msk.f32.vlgmr.msra.gmra.mrb[30].mxu1 %vm1599_vm3, %v3221_v11 }
 0x31d   : > { %v1668_v7 = vpop.f32.mrb[24].mxu0 }
 0x31e   : > { %v1739_v8 = vpop.f32.mrb[24].mxu1  ;;  %v1669_v9 = vadd.f32 %v1668_v7, %v1598_v5  ;;  %v1670_v27 = vpop.f32.mrb[25].mxu0 }
 0x31f   : > { %v1740_v10 = vadd.f32 %v1739_v8, %v1598_v5  ;;  %v1741_v12 = vpop.f32.mrb[25].mxu1  ;;  %v1671_v14 = vadd.f32 %v1670_v27, %v1598_v5 }
 0x320   : > { %v1742_v15 = vadd.f32 %v1741_v12, %v1598_v5 }
 0x321   : > { %v2186_v16 = vcombine.low %v1669_v9, %v1671_v14 }
 0x322   : > { %v2187_v17 = vcombine.low %v1740_v10, %v1742_v15 }
 0x323   : > { %v2196_v11 = vrot.slane %v2186_v16, %v2195_v13 }
 0x324   : > { %v2203_v18 = vrot.slane %v2187_v17, %v2195_v13 }
 0x325   : > { %v1810_v19 = vpop.f32.mrb[26].mxu0 }
 0x326   : > { %v2218_v20 = vcombine.low %v2196_v11, %v2203_v18  ;;  %v1881_v21 = vpop.f32.mrb[26].mxu1  ;;  %v1811_v23 = vadd.f32 %v1810_v19, %v1598_v5  ;;  %v1812_v25 = vpop.f32.mrb[27].mxu0 }
 0x327   : > { %v1882_v24 = vadd.f32 %v1881_v21, %v1598_v5  ;;  %v1883_v26 = vpop.f32.mrb[27].mxu1  ;;  %v1813_v28 = vadd.f32 %v1812_v25, %v1598_v5 }
 0x328   : > { %v1884_v29 = vadd.f32 %v1883_v26, %v1598_v5  ;;  %v2226_v34 = vrot.slane %v2218_v20, %v2195_v13 }
 0x329   : > { %v2188_v30 = vcombine.low %v1811_v23, %v1813_v28 }
 0x32a   : > { %v2189_v31 = vcombine.low %v1882_v24, %v1884_v29 }
 0x32b   : > { %v2210_v32 = vrot.slane %v2188_v30, %v2195_v13 }
 0x32c   : > { %v2217_v33 = vrot.slane %v2189_v31, %v2195_v13 }
 0x32d   : > { %v1952_v36 = vpop.f32.mrb[28].mxu0 }
 0x32e   : > { %v2219_v35 = vcombine.low %v2210_v32, %v2217_v33  ;;  %v2023_v37 = vpop.f32.mrb[28].mxu1  ;;  %v1953_v38 = vadd.f32 %v1952_v36, %v1598_v5  ;;  %v1954_v40 = vpop.f32.mrb[29].mxu0 }
 0x32f   : > { %v2024_v39 = vadd.f32 %v2023_v37, %v1598_v5  ;;  %v2025_v41 = vpop.f32.mrb[29].mxu1  ;;  %v1955_v43 = vadd.f32 %v1954_v40, %v1598_v5 }
 0x330   : > { %v2233_v42 = vrot.slane %v2219_v35, %v2195_v13  ;;  %v2026_v44 = vadd.f32 %v2025_v41, %v1598_v5 }
 0x331   : > { %v2235_v46 = vcombine.low %v1953_v38, %v1955_v43 }
 0x332   : > { %v2234_v45 = vcombine.low %v2226_v34, %v2233_v42  ;;  %v2236_v47 = vcombine.low %v2024_v39, %v2026_v44 }
 0x333   : > { %v2245_v48 = vrot.slane %v2235_v46, %v2195_v13 }
 0x334   : > { %v2252_v49 = vrot.slane %v2236_v47, %v2195_v13  ;;  %2286 = vst [vmem:[%s271_s25] sm:$0xff] %v2234_v45 }
 0x335   : > { %v2094_v51 = vpop.f32.mrb[30].mxu0 }
 0x336   : > { %v2267_v50 = vcombine.low %v2245_v48, %v2252_v49  ;;  %v2165_v52 = vpop.f32.mrb[30].mxu1  ;;  %v2095_v53 = vadd.f32 %v2094_v51, %v1598_v5  ;;  %v2096_v55 = vpop.f32.mrb[31].mxu0 }
 0x337   : > { %v2166_v54 = vadd.f32 %v2165_v52, %v1598_v5  ;;  %v2167_v56 = vpop.f32.mrb[31].mxu1  ;;  %v2097_v57 = vadd.f32 %v2096_v55, %v1598_v5 }
 0x338   : > { %v2168_v58 = vadd.f32 %v2167_v56, %v1598_v5  ;;  %v2275_v1 = vrot.slane %v2267_v50, %v2195_v13 }
 0x339   : > { %v2237_v59 = vcombine.low %v2095_v53, %v2097_v57 }
 0x33a   : > { %v2238_v60 = vcombine.low %v2166_v54, %v2168_v58 }
 0x33b   : > { %v2259_v61 = vrot.slane %v2237_v59, %v2195_v13 }
 0x33c   : > { %v2266_v62 = vrot.slane %v2238_v60, %v2195_v13 }
 0x33e   : > { %v2268_v63 = vcombine.low %v2259_v61, %v2266_v62 }
 0x340   : > { %v2282_v0 = vrot.slane %v2268_v63, %v2195_v13 }
 0x342   : > { %v2283_v2 = vcombine.low %v2275_v1, %v2282_v0 }
 0x344   : > { %2287 = vst [vmem:[%s271_s25 + $0x8] sm:$0xff] %v2283_v2 }
 0x345   : > { %2760 = shalt.err (!%p2757_p0)
}
 0x346   : > { %s2761_s12 = scalar_lea.hbm %s3269_s6, 256  ;;  %s2765_s29 = scalar_lea.hbm %s3322_s4, 512 }
 0x347   : > { %p2762_p4 = scmp.ne.s32.totalorder %s3269_s6, %s2761_s12  ;;  %p2766_p1 = scmp.lt.u32.totalorder %s3269_s6, %s3322_s4 }
 0x348   : > { %p2767_p12 = scmp.lt.u32.totalorder %s2765_s29, %s2761_s12  ;;  %p2769_p13 = scmp.lt.u32.totalorder %s2761_s12, %s3269_s6 }
 0x349   : > { %p2763_p2 = pnand %p2762_p4, %p3027_p10 }
 0x34a   : > { %p2768_p11 = por %p2767_p12, %p2766_p1 }
 0x34b   : > { %p2764_p8 = pneg %p2763_p2 }
 0x34c   : > { %p2770_p6 = por %p2769_p13, %p2768_p11 }
 0x34e   : > { %p2771_p3 = pnand %p2770_p6, %p2764_p8 }
 0x350   : > { %2774 = shalt.err (!%p2771_p3)
}
 0x351   : > { %2535 = dma.vmem_to_hbm [thread:$0]  (%p3027_p10), %s3271_s24, 256, %s3269_s6, %s2289_s8  }
 0x352 PF: > { %s3342_s23 = sld [smem:[#allocation15_spill]]  ;;  %s2317_s25 = sand.u32 1, %s2817_s15  }
 0x353   : > { %p3344_p7 = scmp.ge.s32.totalorder %s2837_s20, 2  ;;  %s2318_s27 = scalar_lea.sflag [#allocation4], %s2317_s25 }
 0x358   : > { %p3343_p5 = scmp.ne.s32.totalorder %s3342_s23, 0 }
 0x35a   : > { %p2552_p9 = pnand %p3344_p7, %p3343_p5 }
 0x35c   : > { %2812 = dma.done.wait (!%p2552_p9), %s2318_s27, 256  }
 0x35d   : > { %2814 = vsyncadd (!%p2552_p9), %s2318_s27, 4294967040  ;;  %s22_s20 = sadd.s32 1, %s2837_s20   ;;  %s3345_s15 = smov %s2821_s16 }
 0x35e   : > { %p19_p0 = scmp.ge.s32.totalorder %s22_s20, 4   ;;  %s3346_s16 = smov %s2825_s17 }
 0x35f   : > { %s3347_s17 = smov %s3039_s10  ;;  %s3348_s18 = smov %s2833_s19 }
 0x360   : > { %s3349_s19 = smov %s3351_s26  ;;  %21 = sbr.rel (!%p19_p0) target bundleno = 8 (0x8), region = 93 }
 0x367   :  { %2323 = vsyncpa [#allocation3], 1 }
 0x368   :  { %2325 = vsyncpa [#allocation3 + $0x1], 1 }
 0x369   :  { %2326 = vsyncpa [#allocation6], 1 }
 0x36a   :  { %2327 = vsyncpa [#allocation9], 1 }
 0x36b   :  { %2328 = vsyncpa [#allocation4], 1 }
 0x36c   :  { %2330 = vsyncpa [#allocation4 + $0x1], 1 }

</bundles_post_ra>
